<compile_context>
chip_gen: v5e
topology: v5e:2x2
jax: 0.10.0
libtpu: 0.0.40
codegen_flags: <defaults>
</compile_context>

<pallas_src>
import functools
import math

import jax
import jax.numpy as jnp
from jax import lax
from jax.experimental import pallas as pl
from jax.experimental.pallas import tpu as pltpu

_INV_SQRT2 = 1.0 / math.sqrt(2.0)


def _gelu(x, approx):
    if approx:
        # tanh form lowers to the EUP slot (effectively free next to the MXU), but
        # does not bit-match torch.nn.GELU() exact.
        return jax.nn.gelu(x, approximate=True)
    # Exact erf GELU -> matches torch.nn.GELU() default.
    return 0.5 * x * (1.0 + lax.erf(x * _INV_SQRT2))


def _round_up(n, m):
    return ((n + m - 1) // m) * m


# ----------------------------------------------------------------------------------
# Kernels
# ----------------------------------------------------------------------------------
def _mlp_kernel_single(x_ref, w1_ref, b1_ref, w2_ref, b2_ref, o_ref, *, approx_gelu):
    # Whole hidden dimension resident: no accumulator, single write to o_ref.
    x = x_ref[...].astype(jnp.bfloat16)
    h = jnp.dot(x, w1_ref[...], preferred_element_type=jnp.float32)
    h = _gelu(h + b1_ref[...], approx_gelu)
    y = jnp.dot(h.astype(jnp.bfloat16), w2_ref[...],
                preferred_element_type=jnp.float32)
    o_ref[...] = (y + b2_ref[...]).astype(o_ref.dtype)


def _mlp_kernel_acc(x_ref, w1_ref, b1_ref, w2_ref, b2_ref, o_ref, acc_ref, *,
                    approx_gelu):
    # Grid: (row tiles, hidden tiles). Axis 1 is a reduction for the second matmul.
    k = pl.program_id(1)

    @pl.when(k == 0)
    def _():
        acc_ref[...] = jnp.zeros_like(acc_ref)

    x = x_ref[...].astype(jnp.bfloat16)
    h = jnp.dot(x, w1_ref[...], preferred_element_type=jnp.float32)
    h = _gelu(h + b1_ref[...], approx_gelu)
    acc_ref[...] += jnp.dot(h.astype(jnp.bfloat16), w2_ref[...],
                            preferred_element_type=jnp.float32)

    @pl.when(k == pl.num_programs(1) - 1)
    def _():
        # b2 added exactly once, in the finalize branch.
        o_ref[...] = (acc_ref[...] + b2_ref[...]).astype(o_ref.dtype)


# ----------------------------------------------------------------------------------
# Wrapper
# ----------------------------------------------------------------------------------
def _chip_defaults(C):
    """Per-generation (tm, th, vmem_limit_bytes) defaults."""
    try:
        kind = jax.devices()[0].device_kind.lower()
    except Exception:  # pragma: no cover - defensive
        kind = ""
    try:
        vmem_cap = int(pltpu.get_tpu_info().vmem_capacity_bytes)
    except Exception:  # pragma: no cover - defensive
        vmem_cap = 128 * 1024 * 1024

    mib = 1024 * 1024
    if "v7" in kind or vmem_cap <= 64 * mib:
        # v7x: 64 MiB VMEM/TC, 3.2 TB/s HBM -> crossover ~310 flops/weight-byte.
        tm, th = 512, (256 if C >= 8192 else 512)
        vmem = max(32 * mib, min(56 * mib, vmem_cap - 8 * mib))
    elif "v6" in kind:
        # v6e: weight-stream crossover ~650 flops/weight-byte -> tm >= ~640.
        tm, th = 768, 512
        vmem = 96 * mib
    elif "v5" in kind:
        # v5e: already MXU-bound at tm=256; bigger tiles buy nothing.
        tm, th = 256, 512
        vmem = 64 * mib
    else:
        tm, th = 512, 512
        vmem = max(32 * mib, min(64 * mib, vmem_cap - 8 * mib))
    return tm, th, vmem


def mlp_pallas(x, w1, b1, w2, b2, *, tm=None, th=None, out_dtype=None,
               approx_gelu=False, vmem_limit_bytes=None):
    """Fused MLP forward: y = gelu(x @ W1 + b1) @ W2 + b2 (dropout = identity).

    x: (B, T, C).  W1: (C, 4C), b1: (1, 4C), W2: (4C, C), b2: (1, C)
    (weights transposed vs torch.nn.Linear). W1/W2 should be held in bf16 by the
    caller to avoid a per-call conversion pass over HBM.
    """
    B, T, C = x.shape
    H = w1.shape[1]  # 4 * C
    M = B * T
    out_dtype = x.dtype if out_dtype is None else jnp.dtype(out_dtype)

    dtm, dth, dvmem = _chip_defaults(C)
    tm = dtm if tm is None else tm
    th = dth if th is None else th
    vmem_limit_bytes = dvmem if vmem_limit_bytes is None else vmem_limit_bytes

    # Row tile: multiple of 8 (sublane); shrink for tiny inputs. A partial last row
    # tile is handled by Pallas masked writes (safe: rows are independent).
    tm = max(8, min(tm, _round_up(M, 8)))
    # Hidden tile: lane-aligned (multiple of 128) and dividing H; otherwise full H.
    th = min(th, H)
    if (H % th != 0) or (th % 128 != 0):
        th = H

    # Safety net: shrink tiles until the double-buffered working set fits the budget.
    def _working_set(tm_, th_):
        db = 2
        return (db * tm_ * C * x.dtype.itemsize          # x blocks
                + db * 2 * C * th_ * 2                   # W1 + W2 blocks (bf16)
                + db * (th_ + C) * 4                     # bias blocks (f32)
                + db * tm_ * C * out_dtype.itemsize      # output blocks
                + tm_ * C * 4                            # f32 accumulator
                + 2 * tm_ * th_ * 4)                     # h temporaries

    while _working_set(tm, th) > 0.9 * vmem_limit_bytes and (tm > 256 or th > 128):
        if tm > 256:
            tm = max(256, tm // 2)
        elif th > 128 and (H % (th // 2) == 0) and ((th // 2) % 128 == 0):
            th = th // 2
        else:
            break

    # No cast / pad / slice passes over the activations: reshape is free (row-major).
    x2d = x.reshape(M, C)
    # Weights: only cast if the caller did not already store them in bf16.
    w1b = w1 if w1.dtype == jnp.bfloat16 else w1.astype(jnp.bfloat16)
    w2b = w2 if w2.dtype == jnp.bfloat16 else w2.astype(jnp.bfloat16)
    b1f = b1.reshape(1, H).astype(jnp.float32)
    b2f = b2.reshape(1, C).astype(jnp.float32)

    num_row_tiles = pl.cdiv(M, tm)
    num_k = H // th

    cost = pl.CostEstimate(
        flops=4 * M * C * H,                               # two matmuls
        transcendentals=M * H,                             # GELU
        bytes_accessed=(M * C * (x.dtype.itemsize + out_dtype.itemsize)
                        + 2 * C * H * 2 * num_row_tiles    # weights restreamed / row tile
                        + (H + C) * 4),
    )

    if num_k == 1:
        kernel = functools.partial(_mlp_kernel_single, approx_gelu=approx_gelu)
        grid_spec = pltpu.PrefetchScalarGridSpec(
            num_scalar_prefetch=0,
            grid=(num_row_tiles,),
            in_specs=[
                pl.BlockSpec((tm, C), lambda i: (i, 0)),   # x tile
                pl.BlockSpec((C, H), lambda i: (0, 0)),    # W1 (whole)
                pl.BlockSpec((1, H), lambda i: (0, 0)),    # b1
                pl.BlockSpec((H, C), lambda i: (0, 0)),    # W2 (whole)
                pl.BlockSpec((1, C), lambda i: (0, 0)),    # b2
            ],
            out_specs=pl.BlockSpec((tm, C), lambda i: (i, 0)),
        )
        dims = ("parallel",)
    else:
        kernel = functools.partial(_mlp_kernel_acc, approx_gelu=approx_gelu)
        grid_spec = pltpu.PrefetchScalarGridSpec(
            num_scalar_prefetch=0,
            grid=(num_row_tiles, num_k),
            in_specs=[
                pl.BlockSpec((tm, C), lambda i, k: (i, 0)),   # x tile (k-invariant)
                pl.BlockSpec((C, th), lambda i, k: (0, k)),   # W1 tile
                pl.BlockSpec((1, th), lambda i, k: (0, k)),   # b1 tile
                pl.BlockSpec((th, C), lambda i, k: (k, 0)),   # W2 tile
                pl.BlockSpec((1, C), lambda i, k: (0, 0)),    # b2 (constant)
            ],
            out_specs=pl.BlockSpec((tm, C), lambda i, k: (i, 0)),
            scratch_shapes=[pltpu.VMEM((tm, C), jnp.float32)],
        )
        dims = ("parallel", "arbitrary")

    out2d = pl.pallas_call(
        kernel,
        out_shape=jax.ShapeDtypeStruct((M, C), out_dtype),
        grid_spec=grid_spec,
        compiler_params=pltpu.CompilerParams(
            dimension_semantics=dims,
            vmem_limit_bytes=int(vmem_limit_bytes),
        ),
        cost_estimate=cost,
    )(x2d, w1b, b1f, w2b, b2f)

    return out2d.reshape(B, T, C)
    # TODO(synk): training-mode dropout (p > 0) would use pltpu.prng_seed +
    # pltpu.prng_random_bits in the finalize branch; here dropout is identity.


# ----------------------------------------------------------------------------------
# Reference (same bf16-operand / f32-accumulate precision strategy)
# ----------------------------------------------------------------------------------
def mlp_reference_bf16(x, w1, b1, w2, b2):
    xb = x.astype(jnp.bfloat16)
    w1b = w1.astype(jnp.bfloat16)
    w2b = w2.astype(jnp.bfloat16)
    h = jnp.dot(xb, w1b, preferred_element_type=jnp.float32) + b1.astype(jnp.float32)
    h = _gelu(h, approx=False)
    y = jnp.dot(h.astype(jnp.bfloat16), w2b,
                preferred_element_type=jnp.float32) + b2.astype(jnp.float32)
    return y.astype(x.dtype)


def _make_params(key, C, H):
    kw1, kb1, kw2, kb2 = jax.random.split(key, 4)
    # nn.Linear-style U(-1/sqrt(fan_in), 1/sqrt(fan_in)) init.
    w1 = jax.random.uniform(kw1, (C, H), jnp.float32,
                            -1.0 / math.sqrt(C), 1.0 / math.sqrt(C))
    b1 = jax.random.uniform(kb1, (1, H), jnp.float32,
                            -1.0 / math.sqrt(C), 1.0 / math.sqrt(C))
    w2 = jax.random.uniform(kw2, (H, C), jnp.float32,
                            -1.0 / math.sqrt(H), 1.0 / math.sqrt(H))
    b2 = jax.random.uniform(kb2, (1, C), jnp.float32,
                            -1.0 / math.sqrt(H), 1.0 / math.sqrt(H))
    return w1, b1, w2, b2


if __name__ == "__main__":
    key = jax.random.PRNGKey(0)
    k_a, k_b, kx_a, kx_b = jax.random.split(key, 4)

    # --- Config A: n_embd=32 (H=128) -> single-pass kernel path -------------------
    B, T, C = 2, 8, 32
    H = 4 * C
    x = jax.random.normal(kx_a, (B, T, C), dtype=jnp.float32)
    w1, b1, w2, b2 = _make_params(k_a, C, H)
    # Weights held persistently in bf16 (as the real model would).
    w1b, w2b = w1.astype(jnp.bfloat16), w2.astype(jnp.bfloat16)

    out_a = jax.block_until_ready(mlp_pallas(x, w1b, b1, w2b, b2))
    ref_a = mlp_reference_bf16(x, w1, b1, w2, b2)
    assert out_a.shape == (B, T, C)
    assert jnp.allclose(out_a, ref_a, atol=2e-2, rtol=2e-2), "config A mismatch"

    # --- Config B: n_embd=64 (H=256), th=128 -> accumulating (2 k-steps) path -----
    B2, T2, C2 = 2, 8, 64
    H2 = 4 * C2
    x2 = jax.random.normal(kx_b, (B2, T2, C2), dtype=jnp.float32)
    w1_2, b1_2, w2_2, b2_2 = _make_params(k_b, C2, H2)
    out_b = jax.block_until_ready(
        mlp_pallas(x2, w1_2.astype(jnp.bfloat16), b1_2,
                   w2_2.astype(jnp.bfloat16), b2_2, th=128))
    ref_b = mlp_reference_bf16(x2, w1_2, b1_2, w2_2, b2_2)
    assert out_b.shape == (B2, T2, C2)
    assert jnp.allclose(out_b, ref_b, atol=2e-2, rtol=2e-2), "config B mismatch"

    print("KERNEL_OK")
</pallas_src>

<mosaic_0001>
module attributes {stable_mosaic.version = 11 : i64} {
  func.func @_mlp_kernel_single(%arg0: i32, %arg1: memref<16x32xf32, #tpu.memory_space<vmem>>, %arg2: memref<32x128xbf16, #tpu.memory_space<vmem>>, %arg3: memref<1x128xf32, #tpu.memory_space<vmem>>, %arg4: memref<128x32xbf16, #tpu.memory_space<vmem>>, %arg5: memref<1x32xf32, #tpu.memory_space<vmem>>, %arg6: memref<16x32xf32, #tpu.memory_space<vmem>>) attributes {dimension_semantics = [#tpu.dimension_semantics<parallel>], iteration_bounds = array<i64: 1>, scalar_prefetch = 0 : i64, scratch_operands = 0 : i64, tpu.core_type = #tpu.core_type<tc>, window_params = [{transform_indices = @transform_0, window_bounds = array<i64: 16, 32>}, {pipeline_mode = #tpu.pipeline_mode<synchronous>, transform_indices = @transform_1, window_bounds = array<i64: 32, 128>}, {pipeline_mode = #tpu.pipeline_mode<synchronous>, transform_indices = @transform_2, window_bounds = array<i64: 1, 128>}, {pipeline_mode = #tpu.pipeline_mode<synchronous>, transform_indices = @transform_3, window_bounds = array<i64: 128, 32>}, {pipeline_mode = #tpu.pipeline_mode<synchronous>, transform_indices = @transform_4, window_bounds = array<i64: 1, 32>}, {transform_indices = @transform_5, window_bounds = array<i64: 16, 32>}]} {
    %c0 = arith.constant 0 : index
    %c0_0 = arith.constant 0 : index
    %0 = vector.load %arg1[%c0, %c0_0] : memref<16x32xf32, #tpu.memory_space<vmem>>, vector<16x32xf32>
    %1 = arith.truncf %0 : vector<16x32xf32> to vector<16x32xbf16>
    %c0_1 = arith.constant 0 : index
    %c0_2 = arith.constant 0 : index
    %2 = vector.load %arg2[%c0_1, %c0_2] : memref<32x128xbf16, #tpu.memory_space<vmem>>, vector<32x128xbf16>
    %cst = arith.constant dense<0.000000e+00> : vector<16x128xf32>
    %3 = tpu.matmul %1, %2, %cst {dimension_numbers = #tpu.dot_dimension_numbers<[1], [0], [0], [1], [0, 0, 1, 1], [], []>} : vector<16x32xbf16>, vector<32x128xbf16>, vector<16x128xf32> -> vector<16x128xf32>
    %c0_3 = arith.constant 0 : index
    %c0_4 = arith.constant 0 : index
    %4 = vector.load %arg3[%c0_3, %c0_4] : memref<1x128xf32, #tpu.memory_space<vmem>>, vector<1x128xf32>
    %5 = vector.broadcast %4 : vector<1x128xf32> to vector<16x128xf32>
    %6 = arith.addf %3, %5 : vector<16x128xf32>
    %cst_5 = arith.constant 5.000000e-01 : f32
    %7 = vector.broadcast %cst_5 : f32 to vector<16x128xf32>
    %8 = arith.mulf %7, %6 : vector<16x128xf32>
    %cst_6 = arith.constant 0.707106769 : f32
    %9 = vector.broadcast %cst_6 : f32 to vector<16x128xf32>
    %10 = arith.mulf %6, %9 : vector<16x128xf32>
    %11 = math.erf %10 : vector<16x128xf32>
    %cst_7 = arith.constant 1.000000e+00 : f32
    %12 = vector.broadcast %cst_7 : f32 to vector<16x128xf32>
    %13 = arith.addf %12, %11 : vector<16x128xf32>
    %14 = arith.mulf %8, %13 : vector<16x128xf32>
    %15 = arith.truncf %14 : vector<16x128xf32> to vector<16x128xbf16>
    %c0_8 = arith.constant 0 : index
    %c0_9 = arith.constant 0 : index
    %16 = vector.load %arg4[%c0_8, %c0_9] : memref<128x32xbf16, #tpu.memory_space<vmem>>, vector<128x32xbf16>
    %cst_10 = arith.constant dense<0.000000e+00> : vector<16x32xf32>
    %17 = tpu.matmul %15, %16, %cst_10 {dimension_numbers = #tpu.dot_dimension_numbers<[1], [0], [0], [1], [0, 0, 1, 1], [], []>} : vector<16x128xbf16>, vector<128x32xbf16>, vector<16x32xf32> -> vector<16x32xf32>
    %c0_11 = arith.constant 0 : index
    %c0_12 = arith.constant 0 : index
    %18 = vector.load %arg5[%c0_11, %c0_12] : memref<1x32xf32, #tpu.memory_space<vmem>>, vector<1x32xf32>
    %19 = vector.broadcast %18 : vector<1x32xf32> to vector<16x32xf32>
    %20 = arith.addf %17, %19 : vector<16x32xf32>
    %c0_13 = arith.constant 0 : index
    %c0_14 = arith.constant 0 : index
    %21 = vector.load %arg6[%c0_13, %c0_14] : memref<16x32xf32, #tpu.memory_space<vmem>>, vector<16x32xf32>
    tpu.vector_store %arg6[%c0_13, %c0_14], %20 {strides = array<i32>} : memref<16x32xf32, #tpu.memory_space<vmem>>, vector<16x32xf32>,
    return
  }
  func.func @transform_0(%arg0: i32) -> (i32, i32) {
    %c0_i32 = arith.constant 0 : i32
    %c0_i32_0 = arith.constant 0 : i32
    return %arg0, %c0_i32 : i32, i32
  }
  func.func @transform_1(%arg0: i32) -> (i32, i32) {
    %c0_i32 = arith.constant 0 : i32
    %c0_i32_0 = arith.constant 0 : i32
    %c0_i32_1 = arith.constant 0 : i32
    return %c0_i32, %c0_i32_0 : i32, i32
  }
  func.func @transform_2(%arg0: i32) -> (i32, i32) {
    %c0_i32 = arith.constant 0 : i32
    %c0_i32_0 = arith.constant 0 : i32
    %c0_i32_1 = arith.constant 0 : i32
    return %c0_i32, %c0_i32_0 : i32, i32
  }
  func.func @transform_3(%arg0: i32) -> (i32, i32) {
    %c0_i32 = arith.constant 0 : i32
    %c0_i32_0 = arith.constant 0 : i32
    %c0_i32_1 = arith.constant 0 : i32
    return %c0_i32, %c0_i32_0 : i32, i32
  }
  func.func @transform_4(%arg0: i32) -> (i32, i32) {
    %c0_i32 = arith.constant 0 : i32
    %c0_i32_0 = arith.constant 0 : i32
    %c0_i32_1 = arith.constant 0 : i32
    return %c0_i32, %c0_i32_0 : i32, i32
  }
  func.func @transform_5(%arg0: i32) -> (i32, i32) {
    %c0_i32 = arith.constant 0 : i32
    %c0_i32_0 = arith.constant 0 : i32
    return %arg0, %c0_i32 : i32, i32
  }
}

</mosaic_0001>

<bundles_post_ra>
// kernel: tpu_custom_call.1
= control target key start
LH: loop header
LB: loop body
LE: loop exit
PB: predicated region body
PF: predicated region fallthrough
CT: control target
= control target key end

     0   :  { %s441_s0 = inlined_call_operand.vmem [shape: f32[16,32], index: 0, kind: input, shape index: {}]   ;;  %s442_s1 = inlined_call_operand.vmem [shape: bf16[32,128], index: 1, kind: input, shape index: {}]   ;;  %s443_s2 = inlined_call_operand.vmem [shape: f32[1,128], index: 2, kind: input, shape index: {}]   ;;  %s444_s3 = inlined_call_operand.vmem [shape: bf16[128,32], index: 3, kind: input, shape index: {}]   ;;  %s445_s4 = inlined_call_operand.vmem [shape: f32[1,32], index: 4, kind: input, shape index: {}]   ;;  %s446_s5 = inlined_call_operand.hbm [shape: f32[16,32], index: 5, kind: output, shape index: {}]  }
   0x1   :  { %v298_v0 = vld [vmem:[%s442_s1 + $0x8] sm:$0xff]  ;;  %v297_v1 = vld [vmem:[%s442_s1] sm:$0xff] }
   0x2   :  { %v22_v2 = vld [vmem:[%s441_s0] sm:$0xff]  ;;  %55 = vmatpush.bf16.msra.mxu0 %v298_v0  ;;  %v23_v3 = vld [vmem:[%s441_s0 + $0x8] sm:$0xff] }
   0x3   :  { %10 = vsyncpa [#allocation3], 0  ;;  %v24_v4 = vpack.c.bf16 %v23_v3, %v22_v2  ;;  %vm45_vm0 = vcmask 261120   ;;  %v310_v5 = vld [vmem:[%s443_s2] ss:$0 sm:$0xff]  ;;  %v306_v6 = vld [vmem:[%s444_s3 + $0x38] sm:$0xff] }
   0x4   :  { %220 = vmatpush.bf16.msra.mxu1 %v306_v6  ;;  %v305_v10 = vld [vmem:[%s444_s3 + $0x30] sm:$0xff]  ;;  %v304_v12 = vld [vmem:[%s444_s3 + $0x28] sm:$0xff]  ;;  %v303_v17 = vld [vmem:[%s444_s3 + $0x20] sm:$0xff]  ;;  %s342_s17 = smov [#allocation2]   ;;  %s242_s21 = sshll.u32 %s446_s5, 4  ;;  %s243_s21 = int_to_ptr.hbm [resolvable:$true] %s242_s21 }
   0x5   :  { %v302_v23 = vld [vmem:[%s444_s3 + $0x18] sm:$0xff]  ;;  %v301_v29 = vld [vmem:[%s444_s3 + $0x10] sm:$0xff]  ;;  %v300_v37 = vld [vmem:[%s444_s3 + $0x8] sm:$0xff]  ;;  %s240_s18 = sshll.u32 %s342_s17, 4  ;;  %s343_s22 = smov 128   ;;  %s241_s18 = int_to_ptr.vmem [resolvable:$true] %s240_s18 }
   0x6   :  { %56 = vmatpush.bf16.msra.mxu0 %v297_v1  ;;  %v299_v44 = vld [vmem:[%s444_s3] sm:$0xff]  ;;  %s344_s23 = smov 8  }
   0x8   :  { %221 = vmatpush.bf16.msra.mxu1 %v305_v10 }
   0x9   :  { %262 = vmatmul.msk.bf16.vlgmr.msra.gmra.mxu0 %vm45_vm0, %v24_v4 }
   0xc   :  { %222 = vmatpush.bf16.msra.mxu1 %v304_v12 }
  0x10   :  { %223 = vmatpush.bf16.msra.mxu1 %v303_v17 }
  0x14   :  { %224 = vmatpush.bf16.msra.mxu1 %v302_v23 }
  0x18   :  { %225 = vmatpush.bf16.msra.mxu1 %v301_v29 }
  0x1c   :  { %226 = vmatpush.bf16.msra.mxu1 %v300_v37 }
  0x20   :  { %227 = vmatpush.bf16.msra.mxu1 %v299_v44 }
  0x86   :  { %v58_v7 = vpop.f32.mrf.mxu0 }
  0x87   :  { %v394_v8 = vadd.f32 %v310_v5, %v58_v7 }
  0x89   :  { %v397_v9 = vmul.f32 0.70710677, %v394_v8 }
  0x8b   :  { %v67_v11 = vmul.f32 %v397_v9, %v397_v9 }
  0x8d   :  { %v68_v13 = vmin.f32 %v67_v11, 16.0 }
  0x8e   :  { %v60_v14 = vpop.f32.mrf.mxu0 }
  0x8f   :  { %v69_v15 = vmul.f32 2.1237322e-06, %v68_v13  ;;  %v407_v16 = vadd.f32 %v310_v5, %v60_v14  ;;  %v80_v18 = vmul.f32 3.8918573e-05, %v68_v13 }
  0x91   :  { %v70_v19 = vadd.f32 0.00028619796, %v69_v15  ;;  %v413_v20 = vmul.f32 0.70710677, %v407_v16  ;;  %v81_v21 = vadd.f32 0.001143296, %v80_v18 }
  0x93   :  { %v107_v22 = vmul.f32 %v413_v20, %v413_v20  ;;  %v71_v24 = vmul.f32 %v70_v19, %v68_v13  ;;  %v82_v25 = vmul.f32 %v81_v21, %v68_v13 }
  0x95   :  { %v108_v26 = vmin.f32 %v107_v22, 16.0  ;;  %v83_v27 = vadd.f32 0.014752088, %v82_v25  ;;  %v72_v31 = vadd.f32 0.0036580483, %v71_v24 }
  0x97   :  { %v109_v28 = vmul.f32 2.1237322e-06, %v108_v26  ;;  %v120_v30 = vmul.f32 3.8918573e-05, %v108_v26  ;;  %v84_v32 = vmul.f32 %v83_v27, %v68_v13  ;;  %v73_v39 = vmul.f32 %v72_v31, %v68_v13 }
  0x98   :  { %v64_v31 = vmul.f32 0.5, %v407_v16 }
  0x99   :  { %v110_v33 = vadd.f32 0.00028619796, %v109_v28  ;;  %v121_v34 = vadd.f32 0.001143296, %v120_v30  ;;  %v85_v35 = vadd.f32 0.112945676, %v84_v32 }
  0x9a   :  { %v74_v46 = vadd.f32 0.05243302, %v73_v39  ;;  %v63_v30 = vmul.f32 0.5, %v394_v8 }
  0x9b   :  { %v111_v36 = vmul.f32 %v110_v33, %v108_v26  ;;  %v122_v38 = vmul.f32 %v121_v34, %v108_v26  ;;  %v86_v40 = vmul.f32 %v85_v35, %v68_v13 }
  0x9c   :  { %v75_v52 = vmul.f32 %v74_v46, %v68_v13 }
  0x9d   :  { %v112_v41 = vadd.f32 0.0036580483, %v111_v36  ;;  %v123_v42 = vadd.f32 0.014752088, %v122_v38  ;;  %v87_v43 = vadd.f32 0.4994258, %v86_v40 }
  0x9e   :  { %v76_v56 = vadd.f32 0.18741608, %v75_v52 }
  0x9f   :  { %v124_v45 = vmul.f32 %v123_v42, %v108_v26  ;;  %v88_v47 = vmul.f32 %v87_v43, %v68_v13  ;;  %v113_v48 = vmul.f32 %v112_v41, %v108_v26 }
  0xa0   :  { %v77_v61 = vmul.f32 %v76_v56, %v68_v13 }
  0xa1   :  { %v125_v49 = vadd.f32 0.112945676, %v124_v45  ;;  %v89_v50 = vadd.f32 1.0, %v88_v47  ;;  %v114_v53 = vadd.f32 0.05243302, %v113_v48 }
  0xa2   :  { %v78_v3 = vadd.f32 1.1283791, %v77_v61 }
  0xa3   :  { %v126_v51 = vmul.f32 %v125_v49, %v108_v26  ;;  %312 = vrcp.f32 %v89_v50  ;;  %v115_v57 = vmul.f32 %v114_v53, %v108_v26  ;;  %v101_v0 = vand.u32 2147483648, %v89_v50 }
  0xa4   :  { %v99_v2 = vand.u32 2147483647, %v89_v50  ;;  %vm95_vm2 = vweird.f32 %v89_v50  ;;  %v79_v12 = vmul.f32 %v78_v3, %v397_v9 }
  0xa5   :  { %v127_v54 = vadd.f32 0.4994258, %v126_v51  ;;  %v116_v62 = vadd.f32 0.18741608, %v115_v57  ;;  %v102_v7 = vor.u32 1.1754944e-38, %v101_v0 }
  0xa6   :  { %vm100_vm4 = vcmp.eq.f32.partialorder %v99_v2, 8.507059e+37 }
  0xa7   :  { %v128_v55 = vmul.f32 %v127_v54, %v108_v26  ;;  %v117_v5 = vmul.f32 %v116_v62, %v108_v26 }
  0xa9   :  { %v129_v58 = vadd.f32 1.0, %v128_v55  ;;  %v313_v59 = vpop.eup %312  ;;  %v118_v15 = vadd.f32 1.1283791, %v117_v5 }
  0xaa   :  { %v91_v60 = vmul.f32 %v313_v59, %v89_v50  ;;  %vm96_vm1 = vweird.f32 %v313_v59 }
  0xab   :  { %314 = vrcp.f32 %v129_v58  ;;  %vm97_vm3 = vmor %vm95_vm2, %vm96_vm1  ;;  %v141_v17 = vand.u32 2147483648, %v129_v58  ;;  %v139_v21 = vand.u32 2147483647, %v129_v58  ;;  %vm135_vm6 = vweird.f32 %v129_v58 }
  0xac   :  { %v92_v63 = vsub.f32 1.0, %v91_v60  ;;  %v119_v24 = vmul.f32 %v118_v15, %v413_v20  ;;  %v311_v20 = vld [vmem:[%s445_s4] ss:$0 sm:$0xff] }
  0xad   :  { %v142_v23 = vor.u32 1.1754944e-38, %v141_v17  ;;  %vm140_vm8 = vcmp.eq.f32.partialorder %v139_v21, 8.507059e+37 }
  0xae   :  { %v93_v1 = vmul.f32 %v313_v59, %v92_v63 }
  0xb0   :  { %v94_v6 = vadd.f32 %v313_v59, %v93_v1 }
  0xb1   :  { %v315_v4 = vpop.eup %314 }
  0xb2   :  { %v131_v10 = vmul.f32 %v315_v4, %v129_v58  ;;  %v98_v11 = vsel %vm97_vm3, %v313_v59, %v94_v6  ;;  %vm136_vm5 = vweird.f32 %v315_v4 }
  0xb3   :  { %v103_v14 = vsel %vm100_vm4, %v102_v7, %v98_v11  ;;  %vm137_vm7 = vmor %vm135_vm6, %vm136_vm5 }
  0xb4   :  { %v132_v13 = vsub.f32 1.0, %v131_v10  ;;  %v104_v18 = vmul.f32 %v103_v14, %v79_v12 }
  0xb6   :  { %v133_v19 = vmul.f32 %v315_v4, %v132_v13  ;;  %v263_v25 = vclamps-f32 %v104_v18, 1.0 }
  0xb8   :  { %v134_v22 = vadd.f32 %v315_v4, %v133_v19  ;;  %v147_v29 = vadd.f32 1.0, %v263_v25 }
  0xba   :  { %v138_v26 = vsel %vm137_vm7, %v315_v4, %v134_v22  ;;  %v149_v33 = vmul.f32 %v147_v29, %v63_v30 }
  0xbb   :  { %v143_v27 = vsel %vm140_vm8, %v142_v23, %v138_v26 }
  0xbc   :  { %v144_v28 = vmul.f32 %v143_v27, %v119_v24 }
  0xbe   :  { %v264_v9 = vclamps-f32 %v144_v28, 1.0 }
  0xc0   :  { %v148_v32 = vadd.f32 1.0, %v264_v9 }
  0xc2   :  { %v150_v34 = vmul.f32 %v148_v32, %v64_v31 }
  0xc4   :  { %v151_v35 = vpack.c.bf16 %v150_v34, %v149_v33 }
  0xc6   :  { %228 = vmatmul.bf16.vlgmr.msra.gmra.mxu1 %v151_v35 }
 0x143   :  { %v229_v36 = vpop.f32.mrf.mxu1 }
 0x144   :  { %v230_v37 = vadd.f32 %v311_v20, %v229_v36 }
 0x146   :  { %234 = vst.msk [vmem:[#allocation2] sm:$0xff] %vm45_vm0, %v230_v37 }
 0x14b   :  { %v231_v8 = vpop.f32.mrf.mxu1 }
 0x14c   :  { %v232_v16 = vadd.f32 %v311_v20, %v231_v8 }
 0x14e   :  { %235 = vst.msk [vmem:[#allocation2 + $0x8] sm:$0xff] %vm45_vm0, %v232_v16 }
 0x14f   :  { %248 = dma.vmem_to_hbm [thread:$0]  %s241_s18, 256, %s243_s21, [#allocation3], %s343_s22, %s343_s22, %s344_s23  }
 0x150   :  { %340 = dma.done.wait [#allocation3], 256  }
 0x151   :  { %341 = vsyncadd [#allocation3], 4294967040 }
 0x152   :  { %253 = vsyncpa [#allocation3], 1 }

</bundles_post_ra>
